<compile_context>
chip_gen: v7x
topology: tpu7x:2x2x1
jax: 0.10.0
libtpu: 0.0.40
codegen_flags: <defaults>
</compile_context>

<pallas_src>
import functools

import jax
import jax.numpy as jnp
from jax.experimental import pallas as pl
from jax.experimental.pallas import tpu as pltpu

D_MODEL = 100                    # feature dim fixed by the module
D_PAD = 128                      # lane-dense padded feature dim
ROW_PAD = 128                    # node-count padding granularity (MXU row tiles)
COMPUTE_DTYPE = jnp.bfloat16     # MXU operand dtype (accumulation is always f32)


# ----------------------------------------------------------------------------
# Pallas kernel: one RGCN conv layer (optionally fused ReLU).
#   grid = (row blocks, contraction blocks over A_flat columns)
# ----------------------------------------------------------------------------
def _rgcn_layer_kernel(x_row_ref, x_col_ref, a_ref, w_ref, root_ref, bias_ref,
                       o_ref, acc_ref, *, apply_relu):
    k = pl.program_id(1)

    @pl.when(k == 0)
    def _init():
        # Self-loop + bias folded into the accumulator init (saves one extra
        # MXU drain + VPU add per layer).
        acc_ref[...] = (
            jnp.dot(x_row_ref[...], root_ref[...],
                    preferred_element_type=jnp.float32)
            + bias_ref[...])

    # Neighbour contribution of this contraction block:
    #   h = X[cols] @ W_r   (bf16 x bf16 -> f32, cast back to bf16 for the big dot)
    #   acc += A[rows, cols] @ h
    h = jnp.dot(x_col_ref[...], w_ref[...], preferred_element_type=jnp.float32)
    acc_ref[...] += jnp.dot(a_ref[...], h.astype(a_ref.dtype),
                            preferred_element_type=jnp.float32)

    @pl.when(k == pl.num_programs(1) - 1)
    def _finalize():
        out = acc_ref[...]
        if apply_relu:
            out = jnp.maximum(out, 0.0)
        o_ref[...] = out.astype(o_ref.dtype)


def _pick_tile(n_pad, cap):
    """Largest multiple of 128 <= cap that divides n_pad (fallback: n_pad)."""
    for t in range(min(cap, n_pad), 0, -128):
        if n_pad % t == 0:
            return t
    return n_pad


def _run_layer(x_in, a_flat, w_cat, root, bias, *, apply_relu, out_dtype,
               n_pad, num_rel, tm, tk):
    bpr = n_pad // tk                      # A column-blocks per relation
    if bpr == 1:
        x_col_map = lambda i, k: (0, 0)
        w_map = lambda i, k: (0, k)
    else:
        x_col_map = lambda i, k: (k % bpr, 0)
        w_map = lambda i, k: (0, k // bpr)

    kernel = functools.partial(_rgcn_layer_kernel, apply_relu=apply_relu)
    return pl.pallas_call(
        kernel,
        out_shape=jax.ShapeDtypeStruct((n_pad, D_PAD), out_dtype),
        grid_spec=pltpu.PrefetchScalarGridSpec(
            num_scalar_prefetch=0,
            grid=(n_pad // tm, num_rel * bpr),
            in_specs=[
                pl.BlockSpec((tm, D_PAD), lambda i, k: (i, 0)),      # X rows (self-loop)
                pl.BlockSpec((tk, D_PAD), x_col_map),                # X cols (neighbour feats)
                pl.BlockSpec((tm, tk), lambda i, k: (i, k)),         # A_flat block
                pl.BlockSpec((D_PAD, D_PAD), w_map),                 # W_r (basis-combined)
                pl.BlockSpec((D_PAD, D_PAD), lambda i, k: (0, 0)),   # root
                pl.BlockSpec((1, D_PAD), lambda i, k: (0, 0)),       # bias
            ],
            out_specs=pl.BlockSpec((tm, D_PAD), lambda i, k: (i, 0)),
            scratch_shapes=[pltpu.VMEM((tm, D_PAD), jnp.float32)],   # f32 accumulator
        ),
        compiler_params=pltpu.CompilerParams(
            dimension_semantics=("parallel", "arbitrary")),
    )(x_in, x_in, a_flat, w_cat, root, bias)


# ----------------------------------------------------------------------------
# Glue: adjacency construction, parameter prep, embedding lookup, forward.
# ----------------------------------------------------------------------------
def _prep_layer_params(layer, num_rel):
    """Basis combination + zero-pad to [128,128] + concat along the output dim."""
    basis, att, root, bias = layer["basis"], layer["att"], layer["root"], layer["bias"]
    nb, d_in, d_out = basis.shape
    w = (att @ basis.reshape(nb, d_in * d_out)).reshape(num_rel, d_in, d_out)
    w_pad = jnp.zeros((num_rel, D_PAD, D_PAD), jnp.float32).at[:, :d_in, :d_out].set(w)
    # W_cat[:, r*128:(r+1)*128] = W_pad[r]
    w_cat = w_pad.transpose(1, 0, 2).reshape(D_PAD, num_rel * D_PAD).astype(COMPUTE_DTYPE)
    root_pad = (jnp.zeros((D_PAD, D_PAD), jnp.float32)
                .at[:d_in, :d_out].set(root).astype(COMPUTE_DTYPE))
    bias_pad = jnp.zeros((1, D_PAD), jnp.float32).at[0, :d_out].set(bias)
    return w_cat, root_pad, bias_pad


def rgcn_forward(params, entity, edge_index, edge_type, edge_norm):
    x = params["entity_embedding"][entity]               # embedding gather (glue), [N, 100]
    n = x.shape[0]
    num_rel = params["conv1"]["att"].shape[0]
    n_pad = ((n + ROW_PAD - 1) // ROW_PAD) * ROW_PAD

    # A_flat built directly in flattened [n_pad, R*n_pad] layout (single scatter,
    # no transpose pass).  PyG convention: edge_index[0]=source j, [1]=target i.
    src, dst = edge_index[0], edge_index[1]
    a_flat = (jnp.zeros((n_pad, num_rel * n_pad), jnp.float32)
              .at[dst, edge_type * n_pad + src].add(edge_norm)
              .astype(COMPUTE_DTYPE))

    x_pad = (jnp.zeros((n_pad, D_PAD), jnp.float32)
             .at[:n, :D_MODEL].set(x).astype(COMPUTE_DTYPE))

    w1, root1, b1 = _prep_layer_params(params["conv1"], num_rel)
    w2, root2, b2 = _prep_layer_params(params["conv2"], num_rel)

    tm = _pick_tile(n_pad, 256)   # output-row tile (parallel axis)
    tk = _pick_tile(n_pad, 512)   # A-column contraction tile (reduction axis)

    common = dict(n_pad=n_pad, num_rel=num_rel, tm=tm, tk=tk)
    x1 = _run_layer(x_pad, a_flat, w1, root1, b1,
                    apply_relu=True, out_dtype=COMPUTE_DTYPE, **common)
    # TODO(synk): F.dropout is identity with training=False (eval mode) — skipped.
    out_pad = _run_layer(x1, a_flat, w2, root2, b2,
                         apply_relu=False, out_dtype=jnp.float32, **common)
    return out_pad[:n, :D_MODEL]


# ----------------------------------------------------------------------------
# Pure-JAX references.
# ----------------------------------------------------------------------------
def build_dense_adjacency(edge_index, edge_type, edge_norm, num_nodes, num_rel):
    src, dst = edge_index[0], edge_index[1]
    adj = jnp.zeros((num_rel, num_nodes, num_nodes), jnp.float32)
    adj = adj.at[edge_type, dst, src].add(edge_norm)
    return adj


def _combine_basis(layer, num_rel):
    basis, att = layer["basis"], layer["att"]
    nb, d_in, d_out = basis.shape
    return (att @ basis.reshape(nb, d_in * d_out)).reshape(num_rel, d_in, d_out)


def rgcn_forward_ref(params, entity, edge_index, edge_type, edge_norm):
    """Full-f32 reference (module semantics)."""
    x = params["entity_embedding"][entity]
    n = x.shape[0]
    num_rel = params["conv1"]["att"].shape[0]
    adj = build_dense_adjacency(edge_index, edge_type, edge_norm, n, num_rel)

    def layer(xin, conv, relu):
        w = _combine_basis(conv, num_rel)
        neigh = jnp.einsum("rij,jd,rdo->io", adj, xin, w)
        out = neigh + xin @ conv["root"] + conv["bias"][None, :]
        return jnp.maximum(out, 0.0) if relu else out

    x1 = layer(x, params["conv1"], True)
    return layer(x1, params["conv2"], False)


def rgcn_forward_ref_mixed(params, entity, edge_index, edge_type, edge_norm, dtype):
    """Plain-JAX reference using the SAME mixed precision as the Pallas kernel
    (dtype matmul operands, f32 accumulation) — validates kernel logic tightly."""
    x = params["entity_embedding"][entity]
    n = x.shape[0]
    num_rel = params["conv1"]["att"].shape[0]
    adj = build_dense_adjacency(edge_index, edge_type, edge_norm, n, num_rel).astype(dtype)

    def layer(x_f32, conv, relu):
        xb = x_f32.astype(dtype)
        w = _combine_basis(conv, num_rel).astype(dtype)
        h = jnp.einsum("nd,rdo->rno", xb, w,
                       preferred_element_type=jnp.float32).astype(dtype)
        neigh = jnp.einsum("rij,rjo->io", adj, h, preferred_element_type=jnp.float32)
        self_t = jnp.dot(xb, conv["root"].astype(dtype),
                         preferred_element_type=jnp.float32)
        out = neigh + self_t + conv["bias"][None, :]
        return jnp.maximum(out, 0.0) if relu else out

    x1 = layer(x, params["conv1"], True)
    return layer(x1, params["conv2"], False)


# ----------------------------------------------------------------------------
if __name__ == "__main__":
    key = jax.random.PRNGKey(0)

    num_entities, num_relations, num_bases = 32, 4, 2
    D = D_MODEL                  # embedding / hidden dim (fixed by the module)
    num_rel2 = num_relations * 2 # RGCNConv uses num_relations * 2
    N, E = num_entities, 64

    keys = jax.random.split(key, 12)

    def xavier(k, shape, gain=1.0):
        fan_in, fan_out = shape[-2], shape[-1]
        a = gain * (6.0 / (fan_in + fan_out)) ** 0.5
        return jax.random.uniform(k, shape, jnp.float32, -a, a)

    params = {
        "entity_embedding": jax.random.normal(keys[0], (num_entities, D), jnp.float32),
        # relation_embedding is only used by distmult/score_loss, not forward()
        "relation_embedding": xavier(keys[1], (num_relations, D), gain=2.0 ** 0.5),
        "conv1": {
            "basis": xavier(keys[2], (num_bases, D, D)),
            "att": xavier(keys[3], (num_rel2, num_bases)),
            "root": xavier(keys[4], (D, D)),
            "bias": jnp.zeros((D,), jnp.float32),
        },
        "conv2": {
            "basis": xavier(keys[5], (num_bases, D, D)),
            "att": xavier(keys[6], (num_rel2, num_bases)),
            "root": xavier(keys[7], (D, D)),
            "bias": jnp.zeros((D,), jnp.float32),
        },
    }

    entity = jnp.arange(N, dtype=jnp.int32)
    src = jax.random.randint(keys[8], (E,), 0, N, dtype=jnp.int32)
    dst = jax.random.randint(keys[9], (E,), 0, N, dtype=jnp.int32)
    edge_index = jnp.stack([src, dst])
    edge_type = jax.random.randint(keys[10], (E,), 0, num_rel2, dtype=jnp.int32)
    edge_norm = jax.random.uniform(keys[11], (E,), jnp.float32, 0.1, 1.0)

    out = rgcn_forward(params, entity, edge_index, edge_type, edge_norm)
    out = jax.block_until_ready(out)
    assert out.shape == (N, D) and out.dtype == jnp.float32

    # Tight check against a plain-JAX reference with identical mixed precision
    # (validates tiling / indexing / accumulation of the kernel).
    ref_mixed = rgcn_forward_ref_mixed(params, entity, edge_index, edge_type,
                                       edge_norm, COMPUTE_DTYPE)
    assert jnp.allclose(out, ref_mixed, atol=2e-3, rtol=2e-3), \
        "mismatch vs mixed-precision JAX reference"

    # Coarse sanity bound vs the full-f32 reference (bf16 MXU operands introduce
    # ~1e-3..1e-2 absolute deviation; structural bugs would be O(1)).
    ref_f32 = rgcn_forward_ref(params, entity, edge_index, edge_type, edge_norm)
    assert jnp.allclose(out, ref_f32, atol=1e-1, rtol=1e-1), \
        "mismatch vs f32 JAX reference"

    print("KERNEL_OK")
</pallas_src>

<mosaic_0001>
module attributes {stable_mosaic.version = 11 : i64} {
  func.func @_rgcn_layer_kernel(%arg0: i32, %arg1: i32, %arg2: memref<128x128xbf16, #tpu.memory_space<vmem>>, %arg3: memref<128x128xbf16, #tpu.memory_space<vmem>>, %arg4: memref<128x128xbf16, #tpu.memory_space<vmem>>, %arg5: memref<128x128xbf16, #tpu.memory_space<vmem>>, %arg6: memref<128x128xbf16, #tpu.memory_space<vmem>>, %arg7: memref<1x128xf32, #tpu.memory_space<vmem>>, %arg8: memref<128x128xbf16, #tpu.memory_space<vmem>>, %arg9: memref<128x128xf32, #tpu.memory_space<vmem>>) attributes {dimension_semantics = [#tpu.dimension_semantics<parallel>, #tpu.dimension_semantics<arbitrary>], iteration_bounds = array<i64: 1, 8>, scalar_prefetch = 0 : i64, scratch_operands = 1 : i64, tpu.core_type = #tpu.core_type<tc>, window_params = [{transform_indices = @transform_0, window_bounds = array<i64: 128, 128>}, {pipeline_mode = #tpu.pipeline_mode<synchronous>, transform_indices = @transform_1, window_bounds = array<i64: 128, 128>}, {transform_indices = @transform_2, window_bounds = array<i64: 128, 128>}, {transform_indices = @transform_3, window_bounds = array<i64: 128, 128>}, {pipeline_mode = #tpu.pipeline_mode<synchronous>, transform_indices = @transform_4, window_bounds = array<i64: 128, 128>}, {pipeline_mode = #tpu.pipeline_mode<synchronous>, transform_indices = @transform_5, window_bounds = array<i64: 1, 128>}, {transform_indices = @transform_6, window_bounds = array<i64: 128, 128>}]} {
    %c0_i32 = arith.constant 0 : i32
    %0 = arith.cmpi eq, %arg1, %c0_i32 : i32
    %1 = arith.extui %0 : i1 to i32
    %c0_i32_0 = arith.constant 0 : i32
    %2 = arith.cmpi ne, %1, %c0_i32_0 : i32
    scf.if %2 {
      %c0_12 = arith.constant 0 : index
      %c0_13 = arith.constant 0 : index
      %15 = vector.load %arg2[%c0_12, %c0_13] : memref<128x128xbf16, #tpu.memory_space<vmem>>, vector<128x128xbf16>
      %c0_14 = arith.constant 0 : index
      %c0_15 = arith.constant 0 : index
      %16 = vector.load %arg6[%c0_14, %c0_15] : memref<128x128xbf16, #tpu.memory_space<vmem>>, vector<128x128xbf16>
      %cst_16 = arith.constant dense<0.000000e+00> : vector<128x128xf32>
      %17 = tpu.matmul %15, %16, %cst_16 {dimension_numbers = #tpu.dot_dimension_numbers<[1], [0], [0], [1], [0, 0, 1, 1], [], []>} : vector<128x128xbf16>, vector<128x128xbf16>, vector<128x128xf32> -> vector<128x128xf32>
      %c0_17 = arith.constant 0 : index
      %c0_18 = arith.constant 0 : index
      %18 = vector.load %arg7[%c0_17, %c0_18] : memref<1x128xf32, #tpu.memory_space<vmem>>, vector<1x128xf32>
      %19 = vector.broadcast %18 : vector<1x128xf32> to vector<128x128xf32>
      %20 = arith.addf %17, %19 : vector<128x128xf32>
      %c0_19 = arith.constant 0 : index
      %c0_20 = arith.constant 0 : index
      %21 = vector.load %arg9[%c0_19, %c0_20] : memref<128x128xf32, #tpu.memory_space<vmem>>, vector<128x128xf32>
      tpu.vector_store %arg9[%c0_19, %c0_20], %20 {strides = array<i32>} : memref<128x128xf32, #tpu.memory_space<vmem>>, vector<128x128xf32>,
    } else {
    }
    %c0 = arith.constant 0 : index
    %c0_1 = arith.constant 0 : index
    %3 = vector.load %arg3[%c0, %c0_1] : memref<128x128xbf16, #tpu.memory_space<vmem>>, vector<128x128xbf16>
    %c0_2 = arith.constant 0 : index
    %c0_3 = arith.constant 0 : index
    %4 = vector.load %arg5[%c0_2, %c0_3] : memref<128x128xbf16, #tpu.memory_space<vmem>>, vector<128x128xbf16>
    %cst = arith.constant dense<0.000000e+00> : vector<128x128xf32>
    %5 = tpu.matmul %3, %4, %cst {dimension_numbers = #tpu.dot_dimension_numbers<[1], [0], [0], [1], [0, 0, 1, 1], [], []>} : vector<128x128xbf16>, vector<128x128xbf16>, vector<128x128xf32> -> vector<128x128xf32>
    %c0_4 = arith.constant 0 : index
    %c0_5 = arith.constant 0 : index
    %6 = vector.load %arg9[%c0_4, %c0_5] : memref<128x128xf32, #tpu.memory_space<vmem>>, vector<128x128xf32>
    %c0_6 = arith.constant 0 : index
    %c0_7 = arith.constant 0 : index
    %7 = vector.load %arg4[%c0_6, %c0_7] : memref<128x128xbf16, #tpu.memory_space<vmem>>, vector<128x128xbf16>
    %8 = arith.truncf %5 : vector<128x128xf32> to vector<128x128xbf16>
    %cst_8 = arith.constant dense<0.000000e+00> : vector<128x128xf32>
    %9 = tpu.matmul %7, %8, %cst_8 {dimension_numbers = #tpu.dot_dimension_numbers<[1], [0], [0], [1], [0, 0, 1, 1], [], []>} : vector<128x128xbf16>, vector<128x128xbf16>, vector<128x128xf32> -> vector<128x128xf32>
    %10 = arith.addf %6, %9 : vector<128x128xf32>
    %c0_9 = arith.constant 0 : index
    %c0_10 = arith.constant 0 : index
    %11 = vector.load %arg9[%c0_9, %c0_10] : memref<128x128xf32, #tpu.memory_space<vmem>>, vector<128x128xf32>
    tpu.vector_store %arg9[%c0_9, %c0_10], %10 {strides = array<i32>} : memref<128x128xf32, #tpu.memory_space<vmem>>, vector<128x128xf32>,
    %c7_i32 = arith.constant 7 : i32
    %12 = arith.cmpi eq, %arg1, %c7_i32 : i32
    %13 = arith.extui %12 : i1 to i32
    %c0_i32_11 = arith.constant 0 : i32
    %14 = arith.cmpi ne, %13, %c0_i32_11 : i32
    scf.if %14 {
      %c0_12 = arith.constant 0 : index
      %c0_13 = arith.constant 0 : index
      %15 = vector.load %arg9[%c0_12, %c0_13] : memref<128x128xf32, #tpu.memory_space<vmem>>, vector<128x128xf32>
      %cst_14 = arith.constant 0.000000e+00 : f32
      %16 = vector.broadcast %cst_14 : f32 to vector<128x128xf32>
      %17 = arith.maximumf %15, %16 : vector<128x128xf32>
      %18 = arith.truncf %17 : vector<128x128xf32> to vector<128x128xbf16>
      %c0_15 = arith.constant 0 : index
      %c0_16 = arith.constant 0 : index
      %19 = vector.load %arg8[%c0_15, %c0_16] : memref<128x128xbf16, #tpu.memory_space<vmem>>, vector<128x128xbf16>
      tpu.vector_store %arg8[%c0_15, %c0_16], %18 {strides = array<i32>} : memref<128x128xbf16, #tpu.memory_space<vmem>>, vector<128x128xbf16>,
    } else {
    }
    return
  }
  func.func @transform_0(%arg0: i32, %arg1: i32) -> (i32, i32) {
    %c0_i32 = arith.constant 0 : i32
    %c0_i32_0 = arith.constant 0 : i32
    return %arg0, %c0_i32 : i32, i32
  }
  func.func @transform_1(%arg0: i32, %arg1: i32) -> (i32, i32) {
    %c0_i32 = arith.constant 0 : i32
    %c0_i32_0 = arith.constant 0 : i32
    %c0_i32_1 = arith.constant 0 : i32
    return %c0_i32, %c0_i32_0 : i32, i32
  }
  func.func @transform_2(%arg0: i32, %arg1: i32) -> (i32, i32) {
    %c0_i32 = arith.constant 0 : i32
    return %arg0, %arg1 : i32, i32
  }
  func.func @transform_3(%arg0: i32, %arg1: i32) -> (i32, i32) {
    %c0_i32 = arith.constant 0 : i32
    %c0_i32_0 = arith.constant 0 : i32
    return %c0_i32, %arg1 : i32, i32
  }
  func.func @transform_4(%arg0: i32, %arg1: i32) -> (i32, i32) {
    %c0_i32 = arith.constant 0 : i32
    %c0_i32_0 = arith.constant 0 : i32
    %c0_i32_1 = arith.constant 0 : i32
    return %c0_i32, %c0_i32_0 : i32, i32
  }
  func.func @transform_5(%arg0: i32, %arg1: i32) -> (i32, i32) {
    %c0_i32 = arith.constant 0 : i32
    %c0_i32_0 = arith.constant 0 : i32
    %c0_i32_1 = arith.constant 0 : i32
    return %c0_i32, %c0_i32_0 : i32, i32
  }
  func.func @transform_6(%arg0: i32, %arg1: i32) -> (i32, i32) {
    %c0_i32 = arith.constant 0 : i32
    %c0_i32_0 = arith.constant 0 : i32
    return %arg0, %c0_i32 : i32, i32
  }
}

</mosaic_0001>

<bundles_post_ra>
// kernel: tpu_custom_call.1
= control target key start
LH: loop header
LB: loop body
LE: loop exit
PB: predicated region body
PF: predicated region fallthrough
CT: control target
= control target key end

     0   :  { %s2356_s0 = inlined_call_operand.hbm [shape: bf16[128,128], index: 0, kind: input, shape index: {}]   ;;  %s2357_s1 = inlined_call_operand.hbm [shape: bf16[128,128], index: 1, kind: input, shape index: {}]   ;;  %s2358_s2 = inlined_call_operand.hbm [shape: bf16[128,1024], index: 2, kind: input, shape index: {}]   ;;  %s2359_s3 = inlined_call_operand.hbm [shape: bf16[128,1024], index: 3, kind: input, shape index: {}]   ;;  %s2360_s4 = inlined_call_operand.hbm [shape: bf16[128,128], index: 4, kind: input, shape index: {}]   ;;  %s2361_s5 = inlined_call_operand.vmem [shape: f32[1,128], index: 5, kind: input, shape index: {}]   ;;  %s2362_s6 = inlined_call_operand.hbm [shape: bf16[128,128], index: 6, kind: output, shape index: {}]  }
   0x1   :  { %2376 = sst [smem:[#allocation21_spill]] %s2356_s0 }
   0x2   :  { %2377 = sst [smem:[#allocation22_spill]] %s2357_s1 }
   0x3   :  { %2378 = sst [smem:[#allocation23_spill]] %s2358_s2 }
   0x4   :  { %11 = vsyncpa [#allocation4], 0 }
   0x5   :  { %12 = vsyncpa [#allocation7], 0 }
   0x6   :  { %13 = vsyncpa [#allocation5], 0  ;;  %s2032_s21 = smov 0   ;;  %s2034_s22 = smov 0  }
   0x7   :  { %s2036_s23 = smov 0   ;;  %s2038_s24 = smov 0  }
   0x8   :  { %s2040_s25 = smov 0   ;;  %s2042_s26 = smov 0  }
   0x9 LB: > { %2379 = sst [smem:[#allocation17_spill]] %s1972_s23  ;;  %s2061_s27 = sadd.s32 4294967295, %s1984_s26   ;;  %s1984_s26 = sphi %s2042_s26, %s19_s26   ;;  %s1980_s25 = sphi %s2040_s25, %s2413_s25   ;;  %s1976_s24 = sphi %s2038_s24, %s2412_s24   ;;  %s1972_s23 = sphi %s2036_s23, %s2408_s23   ;;  %s1968_s22 = sphi %s2034_s22, %s2411_s22   ;;  %s1964_s21 = sphi %s2032_s21, %s2410_s21  }
   0xa   : > { %2380 = sst [smem:[#allocation18_spill]] %s1984_s26  ;;  %p94_p0 = scmp.ne.s32.totalorder %s1972_s23, %s1968_s22 }
   0xb   : > { %p95_p1 = scmp.eq.s32.totalorder %s1984_s26, 0  ;;  %p100_p2 = scmp.ne.s32.totalorder %s1968_s22, %s1964_s21 }
   0xc   : > { %p2363_p3 = scmp.eq.s32.totalorder %s2061_s27, 0  ;;  %p1304_p5 = scmp.ge.s32.totalorder %s1984_s26, 1 }
   0xd   : > { %p96_p4 = por %p95_p1, %p94_p0  ;;  %p205_p7 = scmp.lt.s32.totalorder %s1984_s26, 9 }
   0xe   : > { %p2072_p6 = por %p2363_p3, %p100_p2  ;;  %s1986_s7 = smov [#allocation3]  }
   0xf   : > { %p2077_p8 = pnand %p1304_p5, %p205_p7  ;;  %s220_s8 = sshll.u32 %s1986_s7, 4  ;;  %s2081_s8 = int_to_ptr.vmem [resolvable:$true] %s220_s8 }
  0x10   : > { %s2381_s29 = scalar_select %p2072_p6, 1, 0 }
  0x11   : > { %s2382_s30 = scalar_select %p2077_p8, 1, 0 }
  0x12   : > { %p1625_p9 = pneg %p2077_p8  ;;  %p1645_p10 = scmp.lt.s32.totalorder %s1984_s26, 8 }
  0x13   : > { %s1987_s11 = smov [#allocation6]   ;;  %s2385_s0 = sld [smem:[#allocation21_spill]] }
  0x14   : > { %p2088_p11 = pnand %p1625_p9, %p2363_p3  ;;  %p2092_p12 = pnand %p1645_p10, %p96_p4 }
  0x15   : > { %s233_s12 = sshll.u32 %s1987_s11, 4  ;;  %s2096_s12 = int_to_ptr.vmem [resolvable:$true] %s233_s12 }
  0x16   : > { %s2383_s9 = scalar_select %p2088_p11, 1, 0 }
  0x17   : > { %p2106_p0 = pneg %p2088_p11 }
  0x19   : > { %s1748_s15 = scalar_lea.hbm %s2385_s0, 1024 }
  0x1a   : > { %p1749_p13 = scmp.ne.s32.totalorder %s2385_s0, %s1748_s15  ;;  %p1755_p4 = scmp.lt.u32.totalorder %s1748_s15, %s2385_s0 }
  0x1c   : > { %p1751_p1 = pnand %p2106_p0, %p1749_p13 }
  0x1e   : > { %p1752_p2 = pneg %p1751_p1 }
  0x20   : > { %p1757_p5 = pnand %p1755_p4, %p1752_p2 }
  0x22   : > { %1760 = shalt.err (!%p1757_p5)
}
  0x23   : > { %s1761_s21 = scalar_lea.vmem %s2081_s8, 1024  ;;  %p1769_p3 = scmp.lt.s32.totalorder %s2081_s8, %s2081_s8 }
  0x24   : > { %p1762_p7 = scmp.ne.s32.totalorder %s2081_s8, %s1761_s21  ;;  %p1770_p6 = scmp.lt.s32.totalorder %s1761_s21, %s1761_s21 }
  0x26   : > { %p1764_p9 = pnand %p1762_p7, %p2106_p0  ;;  %p1771_p13 = por %p1770_p6, %p1769_p3 }
  0x28   : > { %p1765_p10 = pneg %p1764_p9 }
  0x2a   : > { %p1772_p1 = pnand %p1771_p13, %p1765_p10 }
  0x2c   : > { %1775 = shalt.err (!%p1772_p1)
}
  0x2d   : > { %s2365_s7 = smov 64   ;;  %s2367_s11 = smov 4  }
  0x2e   : > { %1628 = dma.hbm_to_vmem [thread:$0]  (!%p2088_p11), %s2385_s0, 1024, %s2081_s8, [#allocation4], %s2365_s7, %s2365_s7, %s2367_s11  }
  0x2f   : > { %s2387_s1 = sld [smem:[#allocation22_spill]] }
  0x35   : > { %s1776_s17 = scalar_lea.hbm %s2387_s1, 1024 }
  0x36   : > { %p1777_p3 = scmp.ne.s32.totalorder %s2387_s1, %s1776_s17  ;;  %p1783_p4 = scmp.lt.u32.totalorder %s1776_s17, %s2387_s1 }
  0x38   : > { %p1779_p6 = pnand %p1777_p3, %p2106_p0 }
  0x3a   : > { %p1780_p2 = pneg %p1779_p6 }
  0x3c   : > { %p1785_p5 = pnand %p1783_p4, %p1780_p2 }
  0x3e   : > { %1788 = shalt.err (!%p1785_p5)
}
  0x3f   : > { %s1789_s8 = scalar_lea.vmem %s2096_s12, 1024  ;;  %p1797_p13 = scmp.lt.s32.totalorder %s2096_s12, %s2096_s12 }
  0x40   : > { %p1790_p7 = scmp.ne.s32.totalorder %s2096_s12, %s1789_s8  ;;  %p1798_p1 = scmp.lt.s32.totalorder %s1789_s8, %s1789_s8 }
  0x42   : > { %p1792_p9 = pnand %p1790_p7, %p2106_p0  ;;  %p1799_p3 = por %p1798_p1, %p1797_p13 }
  0x44   : > { %p1793_p10 = pneg %p1792_p9 }
  0x46   : > { %p1800_p6 = pnand %p1799_p3, %p1793_p10 }
  0x48   : > { %1803 = shalt.err (!%p1800_p6)
}
  0x49   : > { %1631 = dma.hbm_to_vmem [thread:$0]  (!%p2088_p11), %s2387_s1, 1024, %s2096_s12, [#allocation7], %s2365_s7, %s2365_s7, %s2367_s11  }
  0x4a   : > { %s263_s14 = sand.u32 1, %s1984_s26   ;;  %s28_s15 = sadd.s32 1, %s1980_s25 }
  0x4b   : > { %p29_p2 = scmp.ge.s32.totalorder %s28_s15, 8  ;;  %s265_s16 = sand.u32 1, %s1972_s23  }
  0x4c   : > { %s2159_s17 = sshll.u32 %s265_s16, 6  ;;  %s2369_s19 = sshll.u32 %s1980_s25, 6 }
  0x4d   : > { %s2415_s15 = smov (%p29_p2, %s28_s15), 0  ;;  %s2389_s2 = sld [smem:[#allocation23_spill]] }
  0x4e   : > { %2388 = sst [smem:[#allocation19_spill]] %s2415_s15  ;;  %s83_s12 = ssub.s32 %s1980_s25, %s2415_s15 }
  0x4f   : > { %s267_s28 = scalar_lea.vmem [#allocation8], %s2159_s17  ;;  %p85_p4 = scmp.eq.s32.totalorder %s83_s12, 0 }
  0x50   : > { %s276_s13 = sshll.u32 %s267_s28, 4  ;;  %s2390_s16 = sadd.s32 1, %s1972_s23  ;;  %s2174_s13 = int_to_ptr.vmem [resolvable:$true] %s276_s13 }
  0x51   : > { %s2179_s7 = scalar_select %p85_p4, %s1972_s23, %s2390_s16  }
  0x52   : > { %s2181_s11 = scalar_lea.sflag [#allocation4], %s263_s14  ;;  %p2375_p7 = pneg %p2092_p12 }
  0x53   : > { %s2169_s8 = scalar_lea.hbm %s2389_s2, %s2369_s19  ;;  %2391 = sst [smem:[#allocation20_spill]] %s2179_s7 }
  0x54   : > { %s1804_s0 = scalar_lea.hbm %s2169_s8, 1024  ;;  %s1809_s28 = scalar_lea.hbm %s2389_s2, 8192 }
  0x55   : > { %p1805_p5 = scmp.ne.s32.totalorder %s2169_s8, %s1804_s0  ;;  %p1810_p13 = scmp.lt.u32.totalorder %s2169_s8, %s2389_s2 }
  0x56   : > { %p1811_p1 = scmp.lt.u32.totalorder %s1809_s28, %s1804_s0  ;;  %p1813_p6 = scmp.lt.u32.totalorder %s1804_s0, %s2169_s8 }
  0x57   : > { %p1807_p9 = pnand %p2375_p7, %p1805_p5 }
  0x58   : > { %p1812_p3 = por %p1811_p1, %p1810_p13 }
  0x59   : > { %p1808_p10 = pneg %p1807_p9 }
  0x5a   : > { %p1814_p2 = por %p1813_p6, %p1812_p3 }
  0x5c   : > { %p1815_p4 = pnand %p1814_p2, %p1808_p10 }
  0x5e   : > { %1818 = shalt.err (!%p1815_p4)
}
  0x5f   : > { %s1819_s14 = scalar_lea.vmem %s2174_s13, 1024  ;;  %s1990_s16 = smov [#allocation8]  }
  0x60   : > { %p1820_p5 = scmp.ne.s32.totalorder %s2174_s13, %s1819_s14  ;;  %s1824_s20 = sshll.u32 %s1990_s16, 4  ;;  %s1825_s20 = int_to_ptr.vmem [resolvable:$false] %s1824_s20 }
  0x61   : > { %s1826_s19 = scalar_lea.vmem %s1825_s20, 2048  ;;  %p1827_p11 = scmp.lt.s32.totalorder %s2174_s13, %s1825_s20 }
  0x62   : > { %p1822_p9 = pnand %p1820_p5, %p2375_p7  ;;  %p1828_p13 = scmp.lt.s32.totalorder %s1826_s19, %s1819_s14 }
  0x64   : > { %p1823_p8 = pneg %p1822_p9  ;;  %p1829_p1 = por %p1828_p13, %p1827_p11 }
  0x66   : > { %p1830_p3 = pnand %p1829_p1, %p1823_p8 }
  0x68   : > { %1833 = shalt.err (!%p1830_p3)
}
  0x69   : > { %s1991_s0 = smov 512   ;;  %s2392_s21 = smov 4  }
  0x6a   : > { %s2393_s28 = smov 64   ;;  %s1992_s12 = smov [#allocation10]  }
  0x6b   : > { %1638 = dma.hbm_to_vmem [thread:$0]  (!%p2092_p12), %s2169_s8, 1024, %s2174_s13, %s2181_s11, %s1991_s0, %s2393_s28, %s2392_s21  }
  0x6c   : > { %s246_s16 = sshll.u32 %s1992_s12, 4  ;;  %s2394_s20 = sshll.u32 %s1980_s25, 6  ;;  %s247_s16 = int_to_ptr.vmem [resolvable:$true] %s246_s16 }
  0x6d   : > { %s2217_s1 = scalar_lea.hbm %s2359_s3, %s2394_s20  ;;  %s1834_s7 = scalar_lea.hbm %s2360_s4, 1024 }
  0x6e   : > { %p1835_p8 = scmp.ne.s32.totalorder %s2360_s4, %s1834_s7  ;;  %p1841_p6 = scmp.lt.u32.totalorder %s1834_s7, %s2360_s4 }
  0x70   : > { %p1837_p11 = pnand %p1835_p8, %p2106_p0 }
  0x72   : > { %p1838_p10 = pneg %p1837_p11 }
  0x74   : > { %p1843_p2 = pnand %p1841_p6, %p1838_p10 }
  0x76   : > { %1846 = shalt.err (!%p1843_p2)
}
  0x77   : > { %s1847_s12 = scalar_lea.vmem %s247_s16, 1024  ;;  %p1855_p13 = scmp.lt.s32.totalorder %s247_s16, %s247_s16 }
  0x78   : > { %p1848_p4 = scmp.ne.s32.totalorder %s247_s16, %s1847_s12  ;;  %p1856_p1 = scmp.lt.s32.totalorder %s1847_s12, %s1847_s12 }
  0x7a   : > { %p1850_p5 = pnand %p1848_p4, %p2106_p0  ;;  %p1857_p3 = por %p1856_p1, %p1855_p13 }
  0x7c   : > { %p1851_p9 = pneg %p1850_p5 }
  0x7e   : > { %p1858_p7 = pnand %p1857_p3, %p1851_p9 }
  0x80   : > { %1861 = shalt.err (!%p1858_p7)
}
  0x81   : > { %p2395_p8 = scmp.ne.s32.totalorder %s2383_s9, 0  ;;  %s290_s26 = scalar_lea.vmem [#allocation9], %s2159_s17 }
  0x82   : > { %s296_s18 = sshll.u32 %s290_s26, 4  ;;  %s1862_s7 = scalar_lea.hbm %s2217_s1, 1024  ;;  %s2241_s18 = int_to_ptr.vmem [resolvable:$true] %s296_s18 }
  0x83   : > { %1634 = dma.hbm_to_vmem [thread:$0]  (!%p2395_p8), %s2360_s4, 1024, %s247_s16, [#allocation7], %s2393_s28, %s2393_s28, %s2392_s21  }
  0x84   : > { %p1863_p0 = scmp.ne.s32.totalorder %s2217_s1, %s1862_s7  ;;  %p2396_p7 = pneg %p2092_p12 }
  0x85   : > { %s1867_s20 = scalar_lea.hbm %s2359_s3, 8192  ;;  %p1868_p6 = scmp.lt.u32.totalorder %s2217_s1, %s2359_s3 }
  0x86   : > { %p1865_p11 = pnand %p1863_p0, %p2396_p7  ;;  %p1869_p2 = scmp.lt.u32.totalorder %s1867_s20, %s1862_s7 }
  0x87   : > { %p1871_p5 = scmp.lt.u32.totalorder %s1862_s7, %s2217_s1 }
  0x88   : > { %p1866_p10 = pneg %p1865_p11  ;;  %p1870_p4 = por %p1869_p2, %p1868_p6 }
  0x8a   : > { %p1872_p9 = por %p1871_p5, %p1870_p4 }
  0x8c   : > { %p1873_p13 = pnand %p1872_p9, %p1866_p10 }
  0x8e   : > { %1876 = shalt.err (!%p1873_p13)
}
  0x8f   : > { %s1877_s17 = scalar_lea.vmem %s2241_s18, 1024  ;;  %p2397_p3 = pmov %p2396_p7 }
  0x90   : > { %p1878_p1 = scmp.ne.s32.totalorder %s2241_s18, %s1877_s17  ;;  %s1993_s16 = smov [#allocation9]  }
  0x91   : > { %s1882_s8 = sshll.u32 %s1993_s16, 4  ;;  %s1883_s8 = int_to_ptr.vmem [resolvable:$false] %s1882_s8 }
  0x92   : > { %p1880_p8 = pnand %p1878_p1, %p2397_p3  ;;  %s1884_s13 = scalar_lea.vmem %s1883_s8, 2048 }
  0x93   : > { %p1885_p7 = scmp.lt.s32.totalorder %s2241_s18, %s1883_s8  ;;  %p1886_p11 = scmp.lt.s32.totalorder %s1884_s13, %s1877_s17 }
  0x94   : > { %p1881_p0 = pneg %p1880_p8 }
  0x95   : > { %p1887_p6 = por %p1886_p11, %p1885_p7 }
  0x97   : > { %p1888_p2 = pnand %p1887_p6, %p1881_p0 }
  0x99   : > { %1891 = shalt.err (!%p1888_p2)
}
  0x9a   : > { %1641 = dma.hbm_to_vmem [thread:$0]  (!%p2092_p12), %s2217_s1, 1024, %s2241_s18, %s2181_s11, %s1991_s0, %s2393_s28, %s2392_s21  }
  0x9b   : > { %p2398_p10 = scmp.ne.s32.totalorder %s2382_s30, 0 }
  0x9c   : > { %p2399_p4 = scmp.eq.s32.totalorder (!%p2398_p10), %s2061_s27, 0 }
  0x9d   : > { %308 = sbr.rel (%p2398_p10) target bundleno = 998 (0x3e6), region = 44 }
  0xa4   : > { %1943 = dma.done.wait (%p2399_p4), [#allocation4], 1024   ;;  %p2400_p5 = pmov %p2399_p4 }
  0xa5   : > { %p2401_p9 = pmov %p2399_p4 }
  0xa6   : > { %1945 = vsyncadd (%p2400_p5), [#allocation4], 4294966272 }
  0xa7   : > { %1947 = dma.done.wait (%p2401_p9), [#allocation7], 1024   ;;  %p2402_p13 = pmov %p2399_p4 }
  0xa8   : > { %s318_s10 = sand.u32 1, %s2061_s27   ;;  %s320_s1 = sand.u32 1, %s1968_s22  }
  0xa9   : > { %1949 = vsyncadd (%p2402_p13), [#allocation7], 4294966272  ;;  %s1316_s11 = sshll.u32 %s320_s1, 6  ;;  %s319_s30 = scalar_lea.sflag [#allocation4], %s318_s10 }
  0xaa   : > { %s2282_s0 = scalar_lea.vmem [#allocation8], %s1316_s11  ;;  %p2403_p12 = scmp.ne.s32.totalorder %s2381_s29, 0 }
  0xac   : > { %1951 = dma.done.wait (%p2403_p12), %s319_s30, 2048  }
  0xad   : > { %1953 = vsyncadd (%p2403_p12), %s319_s30, 4294965248  ;;  %s2288_s21 = scalar_lea.vmem [#allocation9], %s1316_s11  ;;  %p2404_p1 = pmov %p2399_p4 }
  0xaf   : > { %1955 = dma.done.wait (%p2404_p1), [#allocation7], 1024   ;;  %p2405_p3 = pmov %p2404_p1 }
  0xb0   : > { %p1319_p8 = scmp.ne.s32.totalorder %s1976_s24, 0 }
  0xb1   : > { %1957 = vsyncadd (%p2405_p3), [#allocation7], 4294966272  ;;  %v1708_v0 = vld [vmem:[#allocation10] sm:$0xff] (!%p1319_p8)   ;;  %v1709_v1 = vld [vmem:[#allocation10 + $0x8] sm:$0xff] (!%p1319_p8)  }
  0xb2   : > { %371 = sbr.rel (%p1319_p8) target bundleno = 436 (0x1b4), region = 68  ;;  %1493 = vmatprep.subr.bf16.mxu0 (!%p1319_p8), %v1708_v0  ;;  %1589 = vmatprep.subr.bf16.mxu1 (!%p1319_p8), %v1708_v0  ;;  %v1710_v2 = vld [vmem:[#allocation10 + $0x10] sm:$0xff] (!%p1319_p8)   ;;  %v1711_v3 = vld [vmem:[#allocation10 + $0x18] sm:$0xff] (!%p1319_p8)   ;;  %v1716_v4 = vld [vmem:[#allocation3] sm:$0xff] (!%p1319_p8)  }
  0xb3   : > { %1494 = vmatpush3.bf16.msra.mxu0 (!%p1319_p8), %v1708_v0  ;;  %1597 = vmatpush3.bf16.msra.mxu1 (!%p1319_p8), %v1708_v0  ;;  %v1717_v5 = vld [vmem:[#allocation3 + $0x20] sm:$0xff] (!%p1319_p8)   ;;  %v1713_v7 = vld [vmem:[#allocation10 + $0x28] sm:$0xff] (!%p1319_p8)   ;;  %v1714_v8 = vld [vmem:[#allocation10 + $0x30] sm:$0xff] (!%p1319_p8)  }
  0xb4   : > { %1495 = vmatprep.subr.bf16.mxu0 (!%p1319_p8), %v1709_v1  ;;  %1590 = vmatprep.subr.bf16.mxu1 (!%p1319_p8), %v1709_v1  ;;  %v1712_v6 = vld [vmem:[#allocation10 + $0x20] sm:$0xff] (!%p1319_p8)   ;;  %v1715_v9 = vld [vmem:[#allocation10 + $0x38] sm:$0xff] (!%p1319_p8)   ;;  %v1718_v10 = vld [vmem:[#allocation3 + $0x8] sm:$0xff] (!%p1319_p8)  }
  0xb5   : > { %1509 = vmatprep.mubr.bf16.mxu0 (!%p1319_p8), %v1716_v4  ;;  %1517 = vmatprep.mubr.bf16.mxu1 (!%p1319_p8), %v1717_v5  ;;  %v1719_v11 = vld [vmem:[#allocation3 + $0x28] sm:$0xff] (!%p1319_p8)   ;;  %v1720_v12 = vld [vmem:[#allocation3 + $0x10] sm:$0xff] (!%p1319_p8)   ;;  %v1722_v14 = vld [vmem:[#allocation3 + $0x18] sm:$0xff] (!%p1319_p8)  }
  0xb6   : > { %v1721_v13 = vld [vmem:[#allocation3 + $0x30] sm:$0xff] (!%p1319_p8)   ;;  %v1723_v15 = vld [vmem:[#allocation3 + $0x38] sm:$0xff] (!%p1319_p8)   ;;  %v1320_v16 = vld [vmem:[%s2361_s5] ss:$0 sm:$0xff] (!%p1319_p8) }
  0xb7   : > { %1496 = vmatpush3.bf16.msra.mxu0 (!%p1319_p8), %v1709_v1  ;;  %1598 = vmatpush3.bf16.msra.mxu1 (!%p1319_p8), %v1709_v1 }
  0xb8   : > { %1497 = vmatprep.subr.bf16.mxu0 (!%p1319_p8), %v1710_v2  ;;  %1591 = vmatprep.subr.bf16.mxu1 (!%p1319_p8), %v1710_v2 }
  0xbb   : > { %1498 = vmatpush3.bf16.msra.mxu0 %v1710_v2  ;;  %1599 = vmatpush3.bf16.msra.mxu1 %v1710_v2 }
  0xbc   : > { %1499 = vmatprep.subr.bf16.mxu0 %v1711_v3  ;;  %1592 = vmatprep.subr.bf16.mxu1 %v1711_v3 }
  0xbf   : > { %1500 = vmatpush3.bf16.msra.mxu0 %v1711_v3  ;;  %1600 = vmatpush3.bf16.msra.mxu1 %v1711_v3 }
  0xc0   : > { %1501 = vmatprep.subr.bf16.mxu0 %v1712_v6  ;;  %1593 = vmatprep.subr.bf16.mxu1 %v1712_v6 }
  0xc3   : > { %1502 = vmatpush3.bf16.msra.mxu0 %v1712_v6  ;;  %1601 = vmatpush3.bf16.msra.mxu1 %v1712_v6 }
  0xc4   : > { %1503 = vmatprep.subr.bf16.mxu0 %v1713_v7  ;;  %1594 = vmatprep.subr.bf16.mxu1 %v1713_v7 }
  0xc7   : > { %1504 = vmatpush3.bf16.msra.mxu0 %v1713_v7  ;;  %1602 = vmatpush3.bf16.msra.mxu1 %v1713_v7 }
  0xc8   : > { %1505 = vmatprep.subr.bf16.mxu0 %v1714_v8  ;;  %1595 = vmatprep.subr.bf16.mxu1 %v1714_v8 }
  0xcb   : > { %1506 = vmatpush3.bf16.msra.mxu0 %v1714_v8  ;;  %1603 = vmatpush3.bf16.msra.mxu1 %v1714_v8 }
  0xcc   : > { %1507 = vmatprep.subr.bf16.mxu0 %v1715_v9  ;;  %1596 = vmatprep.subr.bf16.mxu1 %v1715_v9 }
  0xcf   : > { %1508 = vmatpush3.bf16.msra.mxu0 %v1715_v9  ;;  %1604 = vmatpush3.bf16.msra.mxu1 %v1715_v9 }
  0xd2   : > { %1510 = vmatmul.mubr.bf16.vlgmr.msra.gmra.mrb[0].mxu0 %v1718_v10  ;;  %1518 = vmatmul.mubr.bf16.vlgmr.msra.gmra.mrb[0].mxu1 %v1719_v11 }
  0xd3   : > { %1513 = vmatprep.mubr.bf16.mxu0 %v1720_v12  ;;  %1521 = vmatprep.mubr.bf16.mxu1 %v1721_v13 }
  0xda   : > { %1514 = vmatmul.mubr.bf16.gmra.mrb[4].mxu0 %v1722_v14  ;;  %1522 = vmatmul.mubr.bf16.gmra.mrb[4].mxu1 %v1723_v15 }
 0x1a5   : > { %v1511_v17 = vpop.f32.mrb[0].mxu0  ;;  %v1519_v18 = vpop.f32.mrb[0].mxu1 }
 0x1a6   : > { %v550_v19 = vadd.f32 %v1511_v17, %v1320_v16  ;;  %v582_v20 = vadd.f32 %v1519_v18, %v1320_v16  ;;  %v541_v21 = vpop.f32.mrb[1].mxu0  ;;  %v573_v22 = vpop.f32.mrb[1].mxu1 }
 0x1a7   : > { %v542_v23 = vadd.f32 %v1320_v16, %v541_v21  ;;  %v574_v24 = vadd.f32 %v1320_v16, %v573_v22  ;;  %v1512_v25 = vpop.f32.mrb[2].mxu0  ;;  %v1520_v26 = vpop.f32.mrb[2].mxu1 }
 0x1a8   : > { %606 = vst [vmem:[#allocation2 + $0x10] sm:$0xff] %v550_v19  ;;  %614 = vst [vmem:[#allocation2 + $0x50] sm:$0xff] %v582_v20  ;;  %v553_v27 = vadd.f32 %v1512_v25, %v1320_v16  ;;  %v585_v28 = vadd.f32 %v1520_v26, %v1320_v16  ;;  %v544_v29 = vpop.f32.mrb[3].mxu0  ;;  %v576_v30 = vpop.f32.mrb[3].mxu1 }
 0x1a9   : > { %604 = vst [vmem:[#allocation2] sm:$0xff] %v542_v23  ;;  %612 = vst [vmem:[#allocation2 + $0x40] sm:$0xff] %v574_v24  ;;  %v545_v31 = vadd.f32 %v1320_v16, %v544_v29  ;;  %v577_v32 = vadd.f32 %v1320_v16, %v576_v30 }
 0x1aa   : > { %607 = vst [vmem:[#allocation2 + $0x18] sm:$0xff] %v553_v27  ;;  %615 = vst [vmem:[#allocation2 + $0x58] sm:$0xff] %v585_v28 }
 0x1ab   : > { %605 = vst [vmem:[#allocation2 + $0x8] sm:$0xff] %v545_v31  ;;  %613 = vst [vmem:[#allocation2 + $0x48] sm:$0xff] %v577_v32 }
 0x1ad   : > { %v1515_v33 = vpop.f32.mrb[4].mxu0  ;;  %v1523_v34 = vpop.f32.mrb[4].mxu1 }
 0x1ae   : > { %v566_v35 = vadd.f32 %v1515_v33, %v1320_v16  ;;  %v598_v36 = vadd.f32 %v1523_v34, %v1320_v16  ;;  %v557_v37 = vpop.f32.mrb[5].mxu0  ;;  %v589_v38 = vpop.f32.mrb[5].mxu1 }
 0x1af   : > { %v558_v39 = vadd.f32 %v1320_v16, %v557_v37  ;;  %v590_v40 = vadd.f32 %v1320_v16, %v589_v38  ;;  %v1516_v41 = vpop.f32.mrb[6].mxu0  ;;  %v1524_v42 = vpop.f32.mrb[6].mxu1 }
 0x1b0   : > { %610 = vst [vmem:[#allocation2 + $0x30] sm:$0xff] %v566_v35  ;;  %618 = vst [vmem:[#allocation2 + $0x70] sm:$0xff] %v598_v36  ;;  %v569_v43 = vadd.f32 %v1516_v41, %v1320_v16  ;;  %v601_v44 = vadd.f32 %v1524_v42, %v1320_v16  ;;  %v560_v45 = vpop.f32.mrb[7].mxu0  ;;  %v592_v46 = vpop.f32.mrb[7].mxu1 }
 0x1b1   : > { %608 = vst [vmem:[#allocation2 + $0x20] sm:$0xff] %v558_v39  ;;  %616 = vst [vmem:[#allocation2 + $0x60] sm:$0xff] %v590_v40  ;;  %v561_v47 = vadd.f32 %v1320_v16, %v560_v45  ;;  %v593_v48 = vadd.f32 %v1320_v16, %v592_v46 }
 0x1b2   : > { %611 = vst [vmem:[#allocation2 + $0x38] sm:$0xff] %v569_v43  ;;  %619 = vst [vmem:[#allocation2 + $0x78] sm:$0xff] %v601_v44 }
 0x1b3   : > { %609 = vst [vmem:[#allocation2 + $0x28] sm:$0xff] %v561_v47  ;;  %617 = vst [vmem:[#allocation2 + $0x68] sm:$0xff] %v593_v48 }
 0x1b4 PF: > { %v1724_v49 = vld [vmem:[%s2288_s21] sm:$0xff]   ;;  %v1725_v50 = vld [vmem:[%s2288_s21 + $0x8] sm:$0xff]   ;;  %v1726_v51 = vld [vmem:[%s2288_s21 + $0x10] sm:$0xff]   ;;  %p1361_p0 = scmp.ne.s32.totalorder %s1976_s24, 7 }
 0x1b5   : > { %1525 = vmatprep.subr.bf16.mxu0 %v1724_v49  ;;  %v1727_v52 = vld [vmem:[%s2288_s21 + $0x18] sm:$0xff]   ;;  %v1732_v53 = vld [vmem:[#allocation6] sm:$0xff]   ;;  %v1729_v55 = vld [vmem:[%s2288_s21 + $0x28] sm:$0xff]  }
 0x1b6   : > { %1526 = vmatpush3.bf16.msra.mxu0 %v1724_v49  ;;  %1541 = vmatprep.mubr.bf16.mxu0 %v1732_v53  ;;  %v1728_v54 = vld [vmem:[%s2288_s21 + $0x20] sm:$0xff]   ;;  %v1730_v56 = vld [vmem:[%s2288_s21 + $0x30] sm:$0xff]   ;;  %v1731_v57 = vld [vmem:[%s2288_s21 + $0x38] sm:$0xff]  }
 0x1b7   : > { %1527 = vmatprep.subr.bf16.mxu0 %v1725_v50  ;;  %v1733_v58 = vld [vmem:[#allocation6 + $0x8] sm:$0xff]   ;;  %v1734_v59 = vld [vmem:[#allocation6 + $0x10] sm:$0xff]   ;;  %v1735_v60 = vld [vmem:[#allocation6 + $0x18] sm:$0xff]  }
 0x1b8   : > { %v1736_v61 = vld [vmem:[#allocation6 + $0x20] sm:$0xff]   ;;  %v1737_v62 = vld [vmem:[#allocation6 + $0x28] sm:$0xff]   ;;  %v1738_v63 = vld [vmem:[#allocation6 + $0x30] sm:$0xff]  }
 0x1b9   : > { %v1739_v0 = vld [vmem:[#allocation6 + $0x38] sm:$0xff]   ;;  %v1740_v1 = vld [vmem:[%s2282_s0] sm:$0xff]   ;;  %v1741_v26 = vld [vmem:[%s2282_s0 + $0x8] sm:$0xff]  }
 0x1ba   : > { %1528 = vmatpush3.bf16.msra.mxu0 %v1725_v50  ;;  %1573 = vmatprep.mubr.bf16.mxu1 %v1740_v1  ;;  %v1742_v27 = vld [vmem:[%s2282_s0 + $0x10] sm:$0xff]   ;;  %v1743_v28 = vld [vmem:[%s2282_s0 + $0x18] sm:$0xff]   ;;  %v1744_v29 = vld [vmem:[%s2282_s0 + $0x20] sm:$0xff]  }
 0x1bb   : > { %1529 = vmatprep.subr.bf16.mxu0 %v1726_v51  ;;  %v1745_v30 = vld [vmem:[%s2282_s0 + $0x28] sm:$0xff]   ;;  %v1746_v31 = vld [vmem:[%s2282_s0 + $0x30] sm:$0xff]   ;;  %v1747_v32 = vld [vmem:[%s2282_s0 + $0x38] sm:$0xff]  }
 0x1bc   : > { %v847_v33 = vld [vmem:[#allocation2 + $0x10] sm:$0xff]  ;;  %v845_v34 = vld [vmem:[#allocation2] sm:$0xff]  ;;  %v848_v36 = vld [vmem:[#allocation2 + $0x18] sm:$0xff] }
 0x1bd   : > { %v846_v39 = vld [vmem:[#allocation2 + $0x8] sm:$0xff]  ;;  %v851_v45 = vld [vmem:[#allocation2 + $0x30] sm:$0xff]  ;;  %v849_v46 = vld [vmem:[#allocation2 + $0x20] sm:$0xff] }
 0x1be   : > { %1530 = vmatpush3.bf16.msra.mxu0 %v1726_v51  ;;  %v852_v48 = vld [vmem:[#allocation2 + $0x38] sm:$0xff]  ;;  %v850_v51 = vld [vmem:[#allocation2 + $0x28] sm:$0xff] }
 0x1bf   : > { %1531 = vmatprep.subr.bf16.mxu0 %v1727_v52 }
 0x1c2   : > { %1532 = vmatpush3.bf16.msra.mxu0 %v1727_v52 }
 0x1c3   : > { %1533 = vmatprep.subr.bf16.mxu0 %v1728_v54 }
 0x1c6   : > { %1534 = vmatpush3.bf16.msra.mxu0 %v1728_v54 }
 0x1c7   : > { %1535 = vmatprep.subr.bf16.mxu0 %v1729_v55 }
 0x1ca   : > { %1536 = vmatpush3.bf16.msra.mxu0 %v1729_v55 }
 0x1cb   : > { %1537 = vmatprep.subr.bf16.mxu0 %v1730_v56 }
 0x1ce   : > { %1538 = vmatpush3.bf16.msra.mxu0 %v1730_v56 }
 0x1cf   : > { %1539 = vmatprep.subr.bf16.mxu0 %v1731_v57 }
 0x1d2   : > { %1540 = vmatpush3.bf16.msra.mxu0 %v1731_v57  ;;  %v855_v57 = vld [vmem:[#allocation2 + $0x50] sm:$0xff] }
 0x1d5   : > { %1542 = vmatmul.mubr.bf16.vlgmr.msra.gmra.mrb[0].mxu0 %v1733_v58  ;;  %v853_v58 = vld [vmem:[#allocation2 + $0x40] sm:$0xff] }
 0x1d6   : > { %1545 = vmatprep.mubr.bf16.mxu0 %v1734_v59 }
 0x1dd   : > { %1546 = vmatmul.mubr.bf16.gmra.mrb[4].mxu0 %v1735_v60  ;;  %v856_v60 = vld [vmem:[#allocation2 + $0x58] sm:$0xff] }
 0x1de   : > { %1549 = vmatprep.mubr.bf16.mxu0 %v1736_v61 }
 0x1e5   : > { %1550 = vmatmul.mubr.bf16.gmra.mrb[8].mxu0 %v1737_v62 }
 0x1e6   : > { %1553 = vmatprep.mubr.bf16.mxu0 %v1738_v63  ;;  %v854_v63 = vld [vmem:[#allocation2 + $0x48] sm:$0xff] }
 0x1ed   : > { %1554 = vmatmul.mubr.bf16.gmra.mrb[12].mxu0 %v1739_v0 }
 0x2a8   : > { %v1543_v2 = vpop.f32.mrb[0].mxu0 }
 0x2a9   : > { %v782_v3 = vpop.f32.mrb[1].mxu0 }
 0x2aa   : > { %v1544_v4 = vpop.f32.mrb[2].mxu0 }
 0x2ab   : > { %v878_v5 = vpack.c.bf16 %v1544_v4, %v1543_v2  ;;  %v785_v6 = vpop.f32.mrb[3].mxu0 }
 0x2ac   : > { %v877_v7 = vpack.c.bf16 %v785_v6, %v782_v3  ;;  %v857_v6 = vld [vmem:[#allocation2 + $0x60] sm:$0xff] }
 0x2ae   : > { %1557 = vmatprep.subr.bf16.mxu1 %v877_v7 }
 0x2af   : > { %1558 = vmatpush3.bf16.msra.mxu1 %v877_v7 }
 0x2b0   : > { %v1547_v8 = vpop.f32.mrb[4].mxu0  ;;  %1559 = vmatprep.subr.bf16.mxu1 %v878_v5 }
 0x2b1   : > { %v798_v9 = vpop.f32.mrb[5].mxu0 }
 0x2b2   : > { %v1548_v10 = vpop.f32.mrb[6].mxu0 }
 0x2b3   : > { %v880_v11 = vpack.c.bf16 %v1548_v10, %v1547_v8  ;;  %v801_v12 = vpop.f32.mrb[7].mxu0  ;;  %1560 = vmatpush3.bf16.msra.mxu1 %v878_v5  ;;  %v859_v5 = vld [vmem:[#allocation2 + $0x70] sm:$0xff]  ;;  %v860_v8 = vld [vmem:[#allocation2 + $0x78] sm:$0xff] }
 0x2b4   : > { %v879_v13 = vpack.c.bf16 %v801_v12, %v798_v9 }
 0x2b6   : > { %1561 = vmatprep.subr.bf16.mxu1 %v879_v13 }
 0x2b7   : > { %1562 = vmatpush3.bf16.msra.mxu1 %v879_v13 }
 0x2b8   : > { %v1551_v14 = vpop.f32.mrb[8].mxu0  ;;  %1563 = vmatprep.subr.bf16.mxu1 %v880_v11 }
 0x2b9   : > { %v814_v15 = vpop.f32.mrb[9].mxu0 }
 0x2ba   : > { %v1552_v16 = vpop.f32.mrb[10].mxu0 }
 0x2bb   : > { %v882_v17 = vpack.c.bf16 %v1552_v16, %v1551_v14  ;;  %v817_v18 = vpop.f32.mrb[11].mxu0  ;;  %1564 = vmatpush3.bf16.msra.mxu1 %v880_v11  ;;  %v858_v11 = vld [vmem:[#allocation2 + $0x68] sm:$0xff] }
 0x2bc   : > { %v881_v19 = vpack.c.bf16 %v817_v18, %v814_v15 }
 0x2be   : > { %1565 = vmatprep.subr.bf16.mxu1 %v881_v19 }
 0x2bf   : > { %1566 = vmatpush3.bf16.msra.mxu1 %v881_v19 }
 0x2c0   : > { %v1555_v20 = vpop.f32.mrb[12].mxu0  ;;  %1567 = vmatprep.subr.bf16.mxu1 %v882_v17 }
 0x2c1   : > { %v830_v21 = vpop.f32.mrb[13].mxu0 }
 0x2c2   : > { %v1556_v22 = vpop.f32.mrb[14].mxu0 }
 0x2c3   : > { %v884_v23 = vpack.c.bf16 %v1556_v22, %v1555_v20  ;;  %v833_v24 = vpop.f32.mrb[15].mxu0  ;;  %1568 = vmatpush3.bf16.msra.mxu1 %v882_v17 }
 0x2c4   : > { %v883_v25 = vpack.c.bf16 %v833_v24, %v830_v21 }
 0x2c6   : > { %1569 = vmatprep.subr.bf16.mxu1 %v883_v25 }
 0x2c7   : > { %1570 = vmatpush3.bf16.msra.mxu1 %v883_v25 }
 0x2c8   : > { %1571 = vmatprep.subr.bf16.mxu1 %v884_v23 }
 0x2cb   : > { %1572 = vmatpush3.bf16.msra.mxu1 %v884_v23 }
 0x2ce   : > { %1574 = vmatmul.mubr.bf16.vlgmr.msra.gmra.mrb[0].mxu1 %v1741_v26 }
 0x2cf   : > { %1577 = vmatprep.mubr.bf16.mxu1 %v1742_v27 }
 0x2d6   : > { %1578 = vmatmul.mubr.bf16.gmra.mrb[4].mxu1 %v1743_v28 }
 0x2d7   : > { %1581 = vmatprep.mubr.bf16.mxu1 %v1744_v29 }
 0x2de   : > { %1582 = vmatmul.mubr.bf16.gmra.mrb[8].mxu1 %v1745_v30 }
 0x2df   : > { %1585 = vmatprep.mubr.bf16.mxu1 %v1746_v31 }
 0x2e6   : > { %1586 = vmatmul.mubr.bf16.gmra.mrb[12].mxu1 %v1747_v32 }
 0x3a1   : > { %v1575_v35 = vpop.f32.mrb[0].mxu1 }
 0x3a2   : > { %v1032_v37 = vadd.f32 %v1575_v35, %v847_v33  ;;  %v967_v38 = vpop.f32.mrb[1].mxu1 }
 0x3a3   : > { %v1030_v40 = vadd.f32 %v967_v38, %v845_v34  ;;  %v1576_v41 = vpop.f32.mrb[2].mxu1 }
 0x3a4   : > { %1048 = vst [vmem:[#allocation2 + $0x10] sm:$0xff] %v1032_v37  ;;  %v1033_v42 = vadd.f32 %v1576_v41, %v848_v36  ;;  %v970_v43 = vpop.f32.mrb[3].mxu1 }
 0x3a5   : > { %1046 = vst [vmem:[#allocation2] sm:$0xff] %v1030_v40  ;;  %v1031_v44 = vadd.f32 %v970_v43, %v846_v39 }
 0x3a6   : > { %1049 = vst [vmem:[#allocation2 + $0x18] sm:$0xff] %v1033_v42 }
 0x3a7   : > { %1047 = vst [vmem:[#allocation2 + $0x8] sm:$0xff] %v1031_v44 }
 0x3a9   : > { %v1579_v47 = vpop.f32.mrb[4].mxu1 }
 0x3aa   : > { %v1036_v49 = vadd.f32 %v1579_v47, %v851_v45  ;;  %v983_v50 = vpop.f32.mrb[5].mxu1 }
 0x3ab   : > { %v1034_v52 = vadd.f32 %v983_v50, %v849_v46  ;;  %v1580_v53 = vpop.f32.mrb[6].mxu1  ;;  %v1068_v19 = vld [vmem:[#allocation2 + $0x10] sm:$0xff] (!%p1361_p0) }
 0x3ac   : > { %1052 = vst [vmem:[#allocation2 + $0x30] sm:$0xff] %v1036_v49  ;;  %v1037_v54 = vadd.f32 %v1580_v53, %v852_v48  ;;  %v986_v55 = vpop.f32.mrb[7].mxu1  ;;  %v1066_v17 = vld [vmem:[#allocation2] sm:$0xff] (!%p1361_p0)  ;;  %v1084_v23 = vmax.f32 (!%p1361_p0), %v1068_v19, 0.0 }
 0x3ad   : > { %1050 = vst [vmem:[#allocation2 + $0x20] sm:$0xff] %v1034_v52  ;;  %v1035_v56 = vadd.f32 %v986_v55, %v850_v51  ;;  %v1082_v20 = vmax.f32 (!%p1361_p0), %v1066_v17, 0.0  ;;  %v1069_v22 = vld [vmem:[#allocation2 + $0x18] sm:$0xff] (!%p1361_p0) }
 0x3ae   : > { %1053 = vst [vmem:[#allocation2 + $0x38] sm:$0xff] %v1037_v54  ;;  %v1067_v18 = vld [vmem:[#allocation2 + $0x8] sm:$0xff] (!%p1361_p0)  ;;  %v1085_v26 = vmax.f32 (!%p1361_p0), %v1069_v22, 0.0 }
 0x3af   : > { %1051 = vst [vmem:[#allocation2 + $0x28] sm:$0xff] %v1035_v56  ;;  %v1083_v21 = vmax.f32 (!%p1361_p0), %v1067_v18, 0.0 }
 0x3b0   : > { %v1406_v39 = vpack.c.bf16 (!%p1361_p0), %v1085_v26, %v1084_v23 }
 0x3b1   : > { %v1583_v59 = vpop.f32.mrb[8].mxu1  ;;  %v1401_v32 = vpack.c.bf16 (!%p1361_p0), %v1083_v21, %v1082_v20 }
 0x3b2   : > { %v1040_v61 = vadd.f32 %v1583_v59, %v855_v57  ;;  %v999_v62 = vpop.f32.mrb[9].mxu1  ;;  %1438 = vst [vmem:[#allocation11 + $0x8] sm:$0xff] (!%p1361_p0), %v1406_v39  }
 0x3b3   : > { %v1038_v0 = vadd.f32 %v999_v62, %v853_v58  ;;  %v1584_v1 = vpop.f32.mrb[10].mxu1  ;;  %v1072_v29 = vld [vmem:[#allocation2 + $0x30] sm:$0xff] (!%p1361_p0)  ;;  %1402 = vst [vmem:[#allocation11] sm:$0xff] (!%p1361_p0), %v1401_v32  }
 0x3b4   : > { %1056 = vst [vmem:[#allocation2 + $0x50] sm:$0xff] %v1040_v61  ;;  %v1041_v2 = vadd.f32 %v1584_v1, %v856_v60  ;;  %v1002_v3 = vpop.f32.mrb[11].mxu1  ;;  %v1070_v24 = vld [vmem:[#allocation2 + $0x20] sm:$0xff] (!%p1361_p0)  ;;  %v1088_v33 = vmax.f32 (!%p1361_p0), %v1072_v29, 0.0 }
 0x3b5   : > { %1054 = vst [vmem:[#allocation2 + $0x40] sm:$0xff] %v1038_v0  ;;  %v1039_v4 = vadd.f32 %v1002_v3, %v854_v63  ;;  %v1086_v27 = vmax.f32 (!%p1361_p0), %v1070_v24, 0.0  ;;  %v1073_v30 = vld [vmem:[#allocation2 + $0x38] sm:$0xff] (!%p1361_p0) }
 0x3b6   : > { %1057 = vst [vmem:[#allocation2 + $0x58] sm:$0xff] %v1041_v2  ;;  %v1071_v25 = vld [vmem:[#allocation2 + $0x28] sm:$0xff] (!%p1361_p0)  ;;  %v1089_v34 = vmax.f32 (!%p1361_p0), %v1073_v30, 0.0 }
 0x3b7   : > { %1055 = vst [vmem:[#allocation2 + $0x48] sm:$0xff] %v1039_v4  ;;  %v1087_v28 = vmax.f32 (!%p1361_p0), %v1071_v25, 0.0 }
 0x3b8   : > { %v1416_v46 = vpack.c.bf16 (!%p1361_p0), %v1089_v34, %v1088_v33 }
 0x3b9   : > { %v1587_v7 = vpop.f32.mrb[12].mxu1  ;;  %1065 = sbr.rel (%p1361_p0) target bundleno = 972 (0x3cc), region = 72  ;;  %v1411_v40 = vpack.c.bf16 (!%p1361_p0), %v1087_v28, %v1086_v27 }
 0x3ba   : > { %v1044_v9 = vadd.f32 %v1587_v7, %v859_v5  ;;  %v1015_v10 = vpop.f32.mrb[13].mxu1  ;;  %1440 = vst [vmem:[#allocation11 + $0x18] sm:$0xff] (!%p1361_p0), %v1416_v46  }
 0x3bb   : > { %v1042_v12 = vadd.f32 %v1015_v10, %v857_v6  ;;  %v1588_v13 = vpop.f32.mrb[14].mxu1  ;;  %v1076_v37 = vld [vmem:[#allocation2 + $0x50] sm:$0xff] (!%p1361_p0)  ;;  %1439 = vst [vmem:[#allocation11 + $0x10] sm:$0xff] (!%p1361_p0), %v1411_v40  }
 0x3bc   : > { %1060 = vst [vmem:[#allocation2 + $0x70] sm:$0xff] %v1044_v9  ;;  %v1045_v14 = vadd.f32 %v1588_v13, %v860_v8  ;;  %v1018_v15 = vpop.f32.mrb[15].mxu1  ;;  %v1074_v31 = vld [vmem:[#allocation2 + $0x40] sm:$0xff] (!%p1361_p0)  ;;  %v1092_v42 = vmax.f32 (!%p1361_p0), %v1076_v37, 0.0 }
 0x3bd   : > { %1058 = vst [vmem:[#allocation2 + $0x60] sm:$0xff] %v1042_v12  ;;  %v1043_v16 = vadd.f32 %v1018_v15, %v858_v11  ;;  %v1090_v36 = vmax.f32 (!%p1361_p0), %v1074_v31, 0.0  ;;  %v1077_v38 = vld [vmem:[#allocation2 + $0x58] sm:$0xff] (!%p1361_p0) }
 0x3be   : > { %1061 = vst [vmem:[#allocation2 + $0x78] sm:$0xff] %v1045_v14  ;;  %v1075_v35 = vld [vmem:[#allocation2 + $0x48] sm:$0xff] (!%p1361_p0)  ;;  %v1093_v47 = vmax.f32 (!%p1361_p0), %v1077_v38, 0.0 }
 0x3bf   : > { %1059 = vst [vmem:[#allocation2 + $0x68] sm:$0xff] %v1043_v16  ;;  %v1091_v41 = vmax.f32 (!%p1361_p0), %v1075_v35, 0.0 }
 0x3c0   : > { %v1426_v54 = vpack.c.bf16 %v1093_v47, %v1092_v42 }
 0x3c1   : > { %v1421_v51 = vpack.c.bf16 %v1091_v41, %v1090_v36 }
 0x3c2   : > { %1442 = vst [vmem:[#allocation11 + $0x28] sm:$0xff] %v1426_v54  }
 0x3c3   : > { %v1080_v45 = vld [vmem:[#allocation2 + $0x70] sm:$0xff]  ;;  %1441 = vst [vmem:[#allocation11 + $0x20] sm:$0xff] %v1421_v51  }
 0x3c4   : > { %v1078_v43 = vld [vmem:[#allocation2 + $0x60] sm:$0xff]  ;;  %v1096_v52 = vmax.f32 %v1080_v45, 0.0 }
 0x3c5   : > { %v1094_v48 = vmax.f32 %v1078_v43, 0.0  ;;  %v1081_v50 = vld [vmem:[#allocation2 + $0x78] sm:$0xff] }
 0x3c6   : > { %v1079_v44 = vld [vmem:[#allocation2 + $0x68] sm:$0xff]  ;;  %v1097_v53 = vmax.f32 %v1081_v50, 0.0 }
 0x3c7   : > { %v1095_v49 = vmax.f32 %v1079_v44, 0.0 }
 0x3c8   : > { %v1436_v56 = vpack.c.bf16 %v1097_v53, %v1096_v52 }
 0x3c9   : > { %v1431_v55 = vpack.c.bf16 %v1095_v49, %v1094_v48 }
 0x3ca   : > { %1444 = vst [vmem:[#allocation11 + $0x38] sm:$0xff] %v1436_v56  }
 0x3cb   : > { %1443 = vst [vmem:[#allocation11 + $0x30] sm:$0xff] %v1431_v55  }
 0x3cc PF: > { %p1649_p7 = scmp.eq.s32.totalorder %s2061_s27, 7  ;;  %s1994_s24 = smov [#allocation11]  }
 0x3cd   : > { %s1187_s12 = sshll.u32 %s1994_s24, 4  ;;  %s1188_s12 = int_to_ptr.vmem [resolvable:$true] %s1187_s12 }
 0x3ce   : > { %s1892_s2 = scalar_lea.vmem %s1188_s12, 1024  ;;  %p1899_p10 = scmp.lt.s32.totalorder %s1188_s12, %s1188_s12 }
 0x3cf   : > { %p1893_p11 = scmp.ne.s32.totalorder %s1188_s12, %s1892_s2  ;;  %p1900_p4 = scmp.lt.s32.totalorder %s1892_s2, %s1892_s2 }
 0x3d1   : > { %p1894_p6 = pnand %p1893_p11, %p1649_p7  ;;  %p1901_p5 = por %p1900_p4, %p1899_p10 }
 0x3d3   : > { %p1895_p2 = pneg %p1894_p6 }
 0x3d5   : > { %p1902_p9 = pnand %p1901_p5, %p1895_p2 }
 0x3d7   : > { %1905 = shalt.err (!%p1902_p9)
}
 0x3d8   : > { %s1906_s18 = scalar_lea.hbm %s2362_s6, 1024 }
 0x3d9   : > { %p1907_p13 = scmp.ne.s32.totalorder %s2362_s6, %s1906_s18  ;;  %p1912_p3 = scmp.lt.u32.totalorder %s1906_s18, %s2362_s6 }
 0x3db   : > { %p1908_p12 = pnand %p1907_p13, %p1649_p7 }
 0x3dd   : > { %p1909_p1 = pneg %p1908_p12 }
 0x3df   : > { %p1914_p8 = pnand %p1912_p3, %p1909_p1 }
 0x3e1   : > { %1917 = shalt.err (!%p1914_p8)
}
 0x3e2   : > { %s1995_s14 = smov 64   ;;  %s1996_s19 = smov 4  }
 0x3e3   : > { %1622 = dma.vmem_to_hbm [thread:$0]  (%p1649_p7), %s1188_s12, 1024, %s2362_s6, [#allocation5], %s1995_s14, %s1995_s14, %s1996_s19  }
 0x3e4   : > { %1959 = dma.done.wait (%p1649_p7), [#allocation5], 1024  }
 0x3e5   : > { %1961 = vsyncadd (%p1649_p7), [#allocation5], 4294966272 }
 0x3e6 PF: > { %s2406_s8 = sld [smem:[#allocation18_spill]]  ;;  %s2407_s13 = sld [smem:[#allocation17_spill]] }
 0x3e7   : > { %s2408_s23 = sld [smem:[#allocation20_spill]]  ;;  %s2409_s10 = sld [smem:[#allocation19_spill]] }
 0x3e8   : > { %s2410_s21 = smov %s1968_s22  ;;  %s2412_s24 = smov %s1980_s25 }
 0x3ec   : > { %s19_s26 = sadd.s32 1, %s2406_s8   ;;  %s2411_s22 = smov %s2407_s13 }
 0x3ed   : > { %p16_p0 = scmp.ge.s32.totalorder %s19_s26, 10   ;;  %s2413_s25 = smov %s2409_s10 }
 0x3ef   :  { %18 = sbr.rel (!%p16_p0) target bundleno = 9 (0x9), region = 113 }
 0x3f6   :  { %1203 = vsyncpa [#allocation4], 1 }
 0x3f7   :  { %1205 = vsyncpa [#allocation4 + $0x1], 1 }
 0x3f8   :  { %1206 = vsyncpa [#allocation7], 1 }
 0x3f9   :  { %1207 = vsyncpa [#allocation5], 1 }
 0x3fa   :  { %1209 = vsyncpa [#allocation5 + $0x1], 1 }

</bundles_post_ra>
